<compile_context>
chip_gen: v7x
topology: tpu7x:2x2x1
jax: 0.10.0
libtpu: 0.0.40
codegen_flags: <defaults>
</compile_context>

<pallas_src>
import functools

import jax
import jax.numpy as jnp
from jax.experimental import pallas as pl
from jax.experimental.pallas import tpu as pltpu


def _round_up(x: int, m: int) -> int:
    return (x + m - 1) // m * m


def _head_kernel(w_ref, b_ref, x_ref, y_ref):
    # w_ref: [R, C] f32 block-diagonal weight, resident in VMEM across steps
    # b_ref: [1, C] f32 tiled bias, resident in VMEM
    # x_ref: [tb, R] input rows, native dtype (upcast here, not in XLA)
    # y_ref: [tb, C] f32 output rows (natural layout after free reshape)
    x = x_ref[...].astype(jnp.float32)
    y = jnp.dot(x, w_ref[...], preferred_element_type=jnp.float32) + b_ref[...]
    y_ref[...] = y.astype(y_ref.dtype)


def _block_diag_weight(w, G):
    """Wbig[g*F + f, g*O + o] = w[f, o], shape [G*F, G*O] (tiny, built once)."""
    F, O = w.shape
    eye = jnp.eye(G, dtype=w.dtype)
    return jnp.einsum("gh,fo->gfho", eye, w).reshape(G * F, G * O)


def _head_main(x2d, w, b, G):
    """Pallas hot path. x2d has M rows with M % G == 0."""
    M, F = x2d.shape
    O = w.shape[1]
    R, C = G * F, G * O                     # 128-wide rows, G*O-wide outputs
    Mr = M // G

    xr = x2d.reshape(Mr, R)                                  # free reshape
    wbig = _block_diag_weight(w.astype(jnp.float32), G)      # [R, C]
    bbig = jnp.tile(jnp.asarray(b, jnp.float32).reshape(-1), G).reshape(1, C)

    # Row tiling: big blocks so each grid step is DMA-bound, not per-step
    # overhead-bound.  (4096, 128) f32 = 2 MiB per step; ~5 MiB double-buffered.
    TB_MAX = 4096
    if Mr <= TB_MAX:
        # Single full block (always layout-legal), unless Mr is big enough that
        # a 2-way split is ~free - then give v7x's two TensorCores a step each.
        tb = _round_up(pl.cdiv(Mr, 2), 8) if Mr >= 2048 else Mr
    else:
        tb = TB_MAX
    grid = (pl.cdiv(Mr, tb),)

    yr = pl.pallas_call(
        _head_kernel,
        out_shape=jax.ShapeDtypeStruct((Mr, C), jnp.float32),
        grid_spec=pltpu.PrefetchScalarGridSpec(
            num_scalar_prefetch=0,
            grid=grid,
            in_specs=[
                pl.BlockSpec((R, C), lambda m: (0, 0)),      # weight, resident
                pl.BlockSpec((1, C), lambda m: (0, 0)),      # bias, resident
                pl.BlockSpec((tb, R), lambda m: (m, 0)),     # input rows
            ],
            out_specs=pl.BlockSpec((tb, C), lambda m: (m, 0)),
        ),
        compiler_params=pltpu.CompilerParams(
            dimension_semantics=("parallel",)),
    )(wbig, bbig, xr)

    return yr.reshape(M, O)                                  # free reshape back


def _linear_head(x2d, w, b):
    """y[M, O] = x2d[M, F] @ w[F, O] + b[O]."""
    M, F = x2d.shape
    G = 128 // F if 128 % F == 0 else 1     # samples packed per 128-lane row
    M_main = (M // G) * G

    parts = []
    if M_main > 0:
        x_main = x2d if M_main == M else x2d[:M_main]
        parts.append(_head_main(x_main, w, b, G))
    if M_main < M:
        # Ragged tail (< G rows): negligible work, evaluate in plain JAX.
        xt = x2d[M_main:].astype(jnp.float32)
        parts.append(xt @ w.astype(jnp.float32)
                     + jnp.asarray(b, jnp.float32).reshape(1, -1))
    return parts[0] if len(parts) == 1 else jnp.concatenate(parts, axis=0)


def _forward_impl(x_d, w, b):
    # TODO(synk): BaseModel.forward is abstract in PyTorch; this deterministic
    # linear head is a minimal stand-in so that sample() has a forward pass.
    B, S, F = x_d.shape
    O = w.shape[1]
    y2d = _linear_head(x_d.reshape(B * S, F), w, b)          # [B*S, O]
    return {"y_hat": y2d.reshape(B, S, O)}


forward = jax.jit(_forward_impl)


@functools.partial(jax.jit, static_argnames=("n_samples", "predict_last_n"))
def sample(data, w, b, n_samples, predict_last_n):
    """BaseModel.sample() semantics: [batch, predict_last_n, n_samples]."""
    # TODO(synk): real sample() relies on a stochastic forward (MC-Dropout);
    # with this deterministic head every sample column is identical, so the
    # n_samples forward passes collapse to one + a broadcast.
    x_d = data["x_d"]
    B = x_d.shape[0]
    y_hat = _forward_impl(x_d, w, b)["y_hat"]
    y0 = y_hat[:, -predict_last_n:, 0]                       # [B, P]
    return jnp.broadcast_to(y0[:, :, None], (B, predict_last_n, n_samples))


if __name__ == "__main__":
    # Small shapes consistent with the module's conventions.
    B, S, F = 2, 16, 8          # batch, seq_len, dynamic input features
    O = 2                       # output_size = len(cfg.target_variables)
    predict_last_n = 4
    n_samples = 3

    key = jax.random.PRNGKey(0)
    kx, kw, kb = jax.random.split(key, 3)

    # Round test inputs to bf16-representable values so the numerical check is
    # exact regardless of the MXU's f32 matmul pass count (precision-agnostic
    # correctness check; real inputs need no such rounding).
    x_d = jax.random.normal(kx, (B, S, F), dtype=jnp.float32)
    x_d = x_d.astype(jnp.bfloat16).astype(jnp.float32)
    w = (jax.random.normal(kw, (F, O), dtype=jnp.float32) * 0.1)
    w = w.astype(jnp.bfloat16).astype(jnp.float32)
    b = (jax.random.normal(kb, (O,), dtype=jnp.float32) * 0.01)
    b = b.astype(jnp.bfloat16).astype(jnp.float32)

    data = {"x_d": x_d}

    # One forward pass through the Pallas kernel.
    y_hat = forward(x_d, w, b)["y_hat"]
    jax.block_until_ready(y_hat)
    assert y_hat.shape == (B, S, O)

    # BaseModel.sample() semantics.
    samples = sample(data, w, b, n_samples, predict_last_n)
    jax.block_until_ready(samples)
    assert samples.shape == (B, predict_last_n, n_samples)

    # Sanity checks against pure-JAX references.
    ref = jnp.einsum("bsf,fo->bso", x_d, w) + b
    assert jnp.allclose(y_hat, ref, atol=1e-5, rtol=1e-5)

    ref_samples = jnp.broadcast_to(ref[:, -predict_last_n:, 0][:, :, None],
                                   (B, predict_last_n, n_samples))
    assert jnp.allclose(samples, ref_samples, atol=1e-5, rtol=1e-5)

    # Ragged batch*seq (M=30 -> 16 kernel rows + 14-row JAX tail) exercises the
    # non-multiple-of-G path.
    B2, S2 = 3, 10
    x2 = jax.random.normal(jax.random.PRNGKey(1), (B2, S2, F), dtype=jnp.float32)
    x2 = x2.astype(jnp.bfloat16).astype(jnp.float32)
    y2 = forward(x2, w, b)["y_hat"]
    jax.block_until_ready(y2)
    ref2 = jnp.einsum("bsf,fo->bso", x2, w) + b
    assert jnp.allclose(y2, ref2, atol=1e-5, rtol=1e-5)

    print("KERNEL_OK")
</pallas_src>

<mosaic_0001>
module attributes {stable_mosaic.version = 11 : i64} {
  func.func @_head_kernel(%arg0: i32, %arg1: memref<128x32xf32, #tpu.memory_space<vmem>>, %arg2: memref<1x32xf32, #tpu.memory_space<vmem>>, %arg3: memref<2x128xf32, #tpu.memory_space<vmem>>, %arg4: memref<2x32xf32, #tpu.memory_space<vmem>>) attributes {dimension_semantics = [#tpu.dimension_semantics<parallel>], iteration_bounds = array<i64: 1>, scalar_prefetch = 0 : i64, scratch_operands = 0 : i64, tpu.core_type = #tpu.core_type<tc>, window_params = [{pipeline_mode = #tpu.pipeline_mode<synchronous>, transform_indices = @transform_0, window_bounds = array<i64: 128, 32>}, {pipeline_mode = #tpu.pipeline_mode<synchronous>, transform_indices = @transform_1, window_bounds = array<i64: 1, 32>}, {transform_indices = @transform_2, window_bounds = array<i64: 2, 128>}, {transform_indices = @transform_3, window_bounds = array<i64: 2, 32>}]} {
    %c0 = arith.constant 0 : index
    %c0_0 = arith.constant 0 : index
    %0 = vector.load %arg3[%c0, %c0_0] : memref<2x128xf32, #tpu.memory_space<vmem>>, vector<2x128xf32>
    %c0_1 = arith.constant 0 : index
    %c0_2 = arith.constant 0 : index
    %1 = vector.load %arg1[%c0_1, %c0_2] : memref<128x32xf32, #tpu.memory_space<vmem>>, vector<128x32xf32>
    %cst = arith.constant dense<0.000000e+00> : vector<2x32xf32>
    %2 = tpu.matmul %0, %1, %cst {dimension_numbers = #tpu.dot_dimension_numbers<[1], [0], [0], [1], [0, 0, 1, 1], [], []>} : vector<2x128xf32>, vector<128x32xf32>, vector<2x32xf32> -> vector<2x32xf32>
    %c0_3 = arith.constant 0 : index
    %c0_4 = arith.constant 0 : index
    %3 = vector.load %arg2[%c0_3, %c0_4] : memref<1x32xf32, #tpu.memory_space<vmem>>, vector<1x32xf32>
    %4 = vector.broadcast %3 : vector<1x32xf32> to vector<2x32xf32>
    %5 = arith.addf %2, %4 : vector<2x32xf32>
    %c0_5 = arith.constant 0 : index
    %c0_6 = arith.constant 0 : index
    %6 = vector.load %arg4[%c0_5, %c0_6] : memref<2x32xf32, #tpu.memory_space<vmem>>, vector<2x32xf32>
    tpu.vector_store %arg4[%c0_5, %c0_6], %5 {strides = array<i32>} : memref<2x32xf32, #tpu.memory_space<vmem>>, vector<2x32xf32>,
    return
  }
  func.func @transform_0(%arg0: i32) -> (i32, i32) {
    %c0_i32 = arith.constant 0 : i32
    %c0_i32_0 = arith.constant 0 : i32
    %c0_i32_1 = arith.constant 0 : i32
    return %c0_i32, %c0_i32_0 : i32, i32
  }
  func.func @transform_1(%arg0: i32) -> (i32, i32) {
    %c0_i32 = arith.constant 0 : i32
    %c0_i32_0 = arith.constant 0 : i32
    %c0_i32_1 = arith.constant 0 : i32
    return %c0_i32, %c0_i32_0 : i32, i32
  }
  func.func @transform_2(%arg0: i32) -> (i32, i32) {
    %c0_i32 = arith.constant 0 : i32
    %c0_i32_0 = arith.constant 0 : i32
    return %arg0, %c0_i32 : i32, i32
  }
  func.func @transform_3(%arg0: i32) -> (i32, i32) {
    %c0_i32 = arith.constant 0 : i32
    %c0_i32_0 = arith.constant 0 : i32
    return %arg0, %c0_i32 : i32, i32
  }
}

</mosaic_0001>

<bundles_post_ra>
// kernel: tile.8
= control target key start
LH: loop header
LB: loop body
LE: loop exit
PB: predicated region body
PF: predicated region fallthrough
CT: control target
= control target key end

     0   :  { %s28_s0 = inlined_call_operand.vmem [shape: f32[2], index: 0, kind: input, shape index: {}]   ;;  %s29_s1 = inlined_call_operand.vmem [shape: f32[16,2], index: 1, kind: output, shape index: {}]  }
   0x1   :  { %v4_v0 = vld [vmem:[%s28_s0] ss:$0 sm:$0xff] }
   0x2   :  { %5 = vst [vmem:[%s29_s1] sm:$0xff] %v4_v0  ;;  %8 = vst [vmem:[%s29_s1 + $0x8] sm:$0xff] %v4_v0 }

// kernel: tile.9
= control target key start
LH: loop header
LB: loop body
LE: loop exit
PB: predicated region body
PF: predicated region fallthrough
CT: control target
= control target key end

     0   :  { %s131_s10 = smov 30   ;;  %s132_s11 = smov 26   ;;  %vm3_vm0 = vcmask 15360   ;;  %vm9_vm1 = vcmask 261360   ;;  %vm15_vm2 = vcmask 244960   ;;  %vm21_vm3 = vcmask 228560   ;;  %s207_s0 = inlined_call_operand.vmem [shape: f32[16,2], index: 0, kind: input, shape index: {}]   ;;  %s208_s1 = inlined_call_operand.vmem [shape: f32[1,32], index: 1, kind: output, shape index: {}]  }
   0x1   :  { %v101_v0 = vld [vmem:[%s207_s0 + $0xf] sm:$0x1]   ;;  %v103_v1 = vld [vmem:[%s207_s0 + $0xd] sm:$0x1]   ;;  %v102_v2 = vld [vmem:[%s207_s0 + $0xe] sm:$0x1]  }
   0x2   :  { %7 = vrot.lane.b32.xlu0 %v101_v0, %s131_s10  ;;  %19 = vrot.lane.b32.xlu1 %v103_v1, %s132_s11  ;;  %v104_v3 = vld [vmem:[%s207_s0 + $0xc] sm:$0x1]   ;;  %s133_s16 = smov 28   ;;  %s134_s17 = smov 24   ;;  %v105_v4 = vld [vmem:[%s207_s0 + $0xb] sm:$0x1]  }
   0x3   :  { %v106_v5 = vld [vmem:[%s207_s0 + $0xa] sm:$0x1]   ;;  %v2_v6 = vld [vmem:[%s207_s0] sm:$0x1]   ;;  %s135_s24 = smov 22   ;;  %s136_s25 = smov 20  }
   0x4   :  { %4 = vst.msk [vmem:[#allocation0] sm:$0x1] %vm3_vm0, %v2_v6   ;;  %v107_v7 = vld [vmem:[%s207_s0 + $0x9] sm:$0x1]   ;;  %v108_v8 = vld [vmem:[%s207_s0 + $0x8] sm:$0x1]  }
   0x5   :  { %s137_s30 = smov 18   ;;  %s138_s2 = smov 16   ;;  %v109_v9 = vld [vmem:[%s207_s0 + $0x7] sm:$0x1]   ;;  %v110_v10 = vld [vmem:[%s207_s0 + $0x6] sm:$0x1]  }
   0x6   :  { %13 = vrot.lane.b32.xlu0 %v102_v2, %s133_s16  ;;  %25 = vrot.lane.b32.xlu1 %v104_v3, %s134_s17  ;;  %s139_s7 = smov 14   ;;  %s140_s8 = smov 12   ;;  %v111_v11 = vld [vmem:[%s207_s0 + $0x5] sm:$0x1]   ;;  %v112_v12 = vld [vmem:[%s207_s0 + $0x4] sm:$0x1]  }
   0x7   :  { %s141_s13 = smov 10   ;;  %s142_s14 = smov 8   ;;  %v113_v13 = vld [vmem:[%s207_s0 + $0x3] sm:$0x1]   ;;  %v114_v14 = vld [vmem:[%s207_s0 + $0x2] sm:$0x1]  }
   0x8   :  { %s143_s19 = smov 6   ;;  %s144_s20 = smov 4   ;;  %v115_v15 = vld [vmem:[%s207_s0 + $0x1] sm:$0x1]   ;;  %vm27_vm4 = vcmask 212160   ;;  %vm33_vm5 = vcmask 195760  }
   0x9   :  { %s145_s0 = smov 2   ;;  %vm39_vm6 = vcmask 179360   ;;  %vm45_vm7 = vcmask 162960   ;;  %vm51_vm8 = vcmask 146560   ;;  %vm57_vm9 = vcmask 130160  }
   0xa   :  { %31 = vrot.lane.b32.xlu0 %v105_v4, %s135_s24  ;;  %37 = vrot.lane.b32.xlu1 %v106_v5, %s136_s25  ;;  %vm63_vm10 = vcmask 113760   ;;  %vm69_vm11 = vcmask 97360   ;;  %vm75_vm12 = vcmask 80960   ;;  %vm81_vm13 = vcmask 64560  }
   0xb   :  { %vm87_vm14 = vcmask 48160   ;;  %vm93_vm15 = vcmask 31760  }
   0xe   :  { %43 = vrot.lane.b32.xlu0 %v107_v7, %s137_s30  ;;  %49 = vrot.lane.b32.xlu1 %v108_v8, %s138_s2 }
  0x12   :  { %55 = vrot.lane.b32.xlu0 %v109_v9, %s139_s7  ;;  %61 = vrot.lane.b32.xlu1 %v110_v10, %s140_s8 }
  0x16   :  { %67 = vrot.lane.b32.xlu0 %v111_v11, %s141_s13  ;;  %73 = vrot.lane.b32.xlu1 %v112_v12, %s142_s14 }
  0x1a   :  { %79 = vrot.lane.b32.xlu0 %v113_v13, %s143_s19  ;;  %85 = vrot.lane.b32.xlu1 %v114_v14, %s144_s20 }
  0x1e   :  { %91 = vrot.lane.b32.xlu0 %v115_v15, %s145_s0 }
  0x74   :  { %v8_v16 = vpop.permute.xlu0 %7   ;;  %v20_v17 = vpop.permute.xlu1 %19  }
  0x75   :  { %10 = vst.msk [vmem:[#allocation0] sm:$0x1] %vm9_vm1, %v8_v16  }
  0x78   :  { %v14_v18 = vpop.permute.xlu0 %13   ;;  %v26_v19 = vpop.permute.xlu1 %25  }
  0x79   :  { %16 = vst.msk [vmem:[#allocation0] sm:$0x1] %vm15_vm2, %v14_v18  }
  0x7a   :  { %22 = vst.msk [vmem:[#allocation0] sm:$0x1] %vm21_vm3, %v20_v17  }
  0x7b   :  { %28 = vst.msk [vmem:[#allocation0] sm:$0x1] %vm27_vm4, %v26_v19  }
  0x7c   :  { %v32_v20 = vpop.permute.xlu0 %31   ;;  %v38_v21 = vpop.permute.xlu1 %37  }
  0x7d   :  { %34 = vst.msk [vmem:[#allocation0] sm:$0x1] %vm33_vm5, %v32_v20  }
  0x7e   :  { %40 = vst.msk [vmem:[#allocation0] sm:$0x1] %vm39_vm6, %v38_v21  }
  0x80   :  { %v44_v22 = vpop.permute.xlu0 %43   ;;  %v50_v23 = vpop.permute.xlu1 %49  }
  0x81   :  { %46 = vst.msk [vmem:[#allocation0] sm:$0x1] %vm45_vm7, %v44_v22  }
  0x82   :  { %52 = vst.msk [vmem:[#allocation0] sm:$0x1] %vm51_vm8, %v50_v23  }
  0x84   :  { %v56_v24 = vpop.permute.xlu0 %55   ;;  %v62_v25 = vpop.permute.xlu1 %61  }
  0x85   :  { %58 = vst.msk [vmem:[#allocation0] sm:$0x1] %vm57_vm9, %v56_v24  }
  0x86   :  { %64 = vst.msk [vmem:[#allocation0] sm:$0x1] %vm63_vm10, %v62_v25  }
  0x88   :  { %v68_v26 = vpop.permute.xlu0 %67   ;;  %v74_v27 = vpop.permute.xlu1 %73  }
  0x89   :  { %70 = vst.msk [vmem:[#allocation0] sm:$0x1] %vm69_vm11, %v68_v26  }
  0x8a   :  { %76 = vst.msk [vmem:[#allocation0] sm:$0x1] %vm75_vm12, %v74_v27  }
  0x8c   :  { %v80_v28 = vpop.permute.xlu0 %79   ;;  %v86_v29 = vpop.permute.xlu1 %85  }
  0x8d   :  { %82 = vst.msk [vmem:[#allocation0] sm:$0x1] %vm81_vm13, %v80_v28  }
  0x8e   :  { %88 = vst.msk [vmem:[#allocation0] sm:$0x1] %vm87_vm14, %v86_v29  }
  0x90   :  { %v92_v30 = vpop.permute.xlu0 %91  }
  0x91   :  { %94 = vst.msk [vmem:[#allocation0] sm:$0x1] %vm93_vm15, %v92_v30  }
  0x98   :  { %v98_v31 = vld [vmem:[#allocation0] sm:$0x1] }
  0x99   :  { %100 = vst [vmem:[%s208_s1] sm:$0x1] %v98_v31 }

// kernel: _forward_impl.1
= control target key start
LH: loop header
LB: loop body
LE: loop exit
PB: predicated region body
PF: predicated region fallthrough
CT: control target
= control target key end

     0   :  { %v194_v0 = vmov 0.0|0.0   ;;  %vm195_vm0 = vmmov 0   ;;  %v196_v4 = vmov 0.0   ;;  %vm108_vm1 = vcmask 254976   ;;  %s274_s0 = inlined_call_operand.vmem [shape: f32[128,32], index: 0, kind: input, shape index: {}]   ;;  %s275_s2 = inlined_call_operand.vmem [shape: f32[2,128], index: 2, kind: input, shape index: {}]   ;;  %s276_s1 = inlined_call_operand.vmem [shape: f32[1,32], index: 1, kind: input, shape index: {}]   ;;  %s277_s3 = inlined_call_operand.vmem [shape: f32[2,32], index: 3, kind: output, shape index: {}]  }
   0x1   :  { %167 = vmatprep.subr.bf16.mxu0 %v194_v0  ;;  %v15_v1 = vld [vmem:[%s274_s0] sm:$0xff]  ;;  %v16_v2 = vld [vmem:[%s274_s0 + $0x8] sm:$0xff]  ;;  %v17_v3 = vld [vmem:[%s274_s0 + $0x10] sm:$0xff]  ;;  %164 = vmatprep.mubr.msk.f32.mxu0 %vm195_vm0, %v196_v4 }
   0x2   :  { %v168_v5 = vpack.c.bf16 %v16_v2, %v15_v1  ;;  %v18_v6 = vld [vmem:[%s274_s0 + $0x18] sm:$0xff]  ;;  %v19_v8 = vld [vmem:[%s274_s0 + $0x20] sm:$0xff]  ;;  %v20_v9 = vld [vmem:[%s274_s0 + $0x28] sm:$0xff] }
   0x3   :  { %v171_v7 = vpack.c.bf16 %v18_v6, %v17_v3  ;;  %v174_v10 = vpack.c.bf16 %v20_v9, %v19_v8  ;;  %v21_v11 = vld [vmem:[%s274_s0 + $0x30] sm:$0xff]  ;;  %v22_v12 = vld [vmem:[%s274_s0 + $0x38] sm:$0xff]  ;;  %v23_v14 = vld [vmem:[%s274_s0 + $0x40] sm:$0xff] }
   0x4   :  { %169 = vmatpush3.bf16.msra.mxu0 %v168_v5  ;;  %v177_v13 = vpack.c.bf16 %v22_v12, %v21_v11  ;;  %v24_v15 = vld [vmem:[%s274_s0 + $0x48] sm:$0xff]  ;;  %v25_v17 = vld [vmem:[%s274_s0 + $0x50] sm:$0xff]  ;;  %v26_v18 = vld [vmem:[%s274_s0 + $0x58] sm:$0xff] }
   0x5   :  { %170 = vmatprep.subr.bf16.mxu0 %v194_v0  ;;  %v180_v16 = vpack.c.bf16 %v24_v15, %v23_v14  ;;  %v183_v19 = vpack.c.bf16 %v26_v18, %v25_v17  ;;  %v27_v20 = vld [vmem:[%s274_s0 + $0x60] sm:$0xff]  ;;  %v28_v21 = vld [vmem:[%s274_s0 + $0x68] sm:$0xff]  ;;  %v29_v23 = vld [vmem:[%s274_s0 + $0x70] sm:$0xff] }
   0x6   :  { %v186_v22 = vpack.c.bf16 %v28_v21, %v27_v20  ;;  %v30_v24 = vld [vmem:[%s274_s0 + $0x78] sm:$0xff]  ;;  %v14_v26 = vld [vmem:[%s275_s2] sm:$0x3] }
   0x7   :  { %v189_v25 = vpack.c.bf16 %v30_v24, %v29_v23  ;;  %v114_v27 = vld [vmem:[%s276_s1] ss:$0 sm:$0xff] }
   0x8   :  { %172 = vmatpush3.bf16.msra.mxu0 %v171_v7 }
   0x9   :  { %173 = vmatprep.subr.bf16.mxu0 %v194_v0 }
   0xc   :  { %175 = vmatpush3.bf16.msra.mxu0 %v174_v10 }
   0xd   :  { %176 = vmatprep.subr.bf16.mxu0 %v194_v0 }
  0x10   :  { %178 = vmatpush3.bf16.msra.mxu0 %v177_v13 }
  0x11   :  { %179 = vmatprep.subr.bf16.mxu0 %v194_v0 }
  0x14   :  { %181 = vmatpush3.bf16.msra.mxu0 %v180_v16 }
  0x15   :  { %182 = vmatprep.subr.bf16.mxu0 %v194_v0 }
  0x18   :  { %184 = vmatpush3.bf16.msra.mxu0 %v183_v19 }
  0x19   :  { %185 = vmatprep.subr.bf16.mxu0 %v194_v0 }
  0x1c   :  { %187 = vmatpush3.bf16.msra.mxu0 %v186_v22 }
  0x1d   :  { %188 = vmatprep.subr.bf16.mxu0 %v194_v0 }
  0x20   :  { %190 = vmatpush3.bf16.msra.mxu0 %v189_v25 }
  0x23   :  { %165 = vmatmul.mubr.f32.vlgmr.msra.gmra.mrb[0].mxu0 %v14_v26 }
  0xf6   :  { %v104_v28 = vpop.f32.mrb[0].mxu0 }
  0xf7   :  { %v105_v29 = vadd.f32 %v114_v27, %v104_v28  ;;  %v166_v30 = vpop.f32.mrb[1].mxu0 }
  0xf9   :  { %109 = vst.msk [vmem:[%s277_s3] sm:$0x3] %vm108_vm1, %v105_v29 }

</bundles_post_ra>
